<compile_context>
chip_gen: v7x
topology: tpu7x:2x2x1
jax: 0.10.0
libtpu: 0.0.40
codegen_flags: <defaults>
</compile_context>

<pallas_src>
import functools

import jax
import jax.numpy as jnp
from jax.experimental import pallas as pl
from jax.experimental.pallas import tpu as pltpu

LEAKY_SLOPE = 0.01   # nn.LeakyReLU default
BN_EPS = 1e-5        # nn.BatchNorm2d default


def _round_up(x, m):
    return (x + m - 1) // m * m


def _cdiv(a, b):
    return (a + b - 1) // b


def _choose_tile_m(m, requested, *, min_tiles=4, min_tile=128):
    """Sublane-aligned tile size: shrink from `requested` until the grid has
    at least `min_tiles` steps (v7x megacore + pipeline overlap), but never
    below `min_tile` rows and never above the problem size."""
    t = max(16, _round_up(min(requested, m), 16))
    while t > min_tile and _cdiv(m, t) < min_tiles:
        t = max(min_tile, _round_up(t // 2, 16))
    return t


def _im2col(x, kh, kw, stride, padding):
    """x: [N, C, H, W] -> patches [N*OH*OW, C*KH*KW], plus (OH, OW)."""
    n, c, h, w = x.shape
    xp = jnp.pad(x, ((0, 0), (0, 0), (padding, padding), (padding, padding)))
    oh = (h + 2 * padding - kh) // stride + 1
    ow = (w + 2 * padding - kw) // stride + 1
    cols = []
    for i in range(kh):
        for j in range(kw):
            sl = xp[:, :, i:i + stride * oh:stride, j:j + stride * ow:stride]
            cols.append(sl)                                    # [N, C, OH, OW]
    pat = jnp.stack(cols, axis=0)                              # [KH*KW, N, C, OH, OW]
    pat = jnp.transpose(pat, (1, 3, 4, 2, 0))                  # [N, OH, OW, C, KH*KW]
    pat = pat.reshape(n * oh * ow, c * kh * kw)
    return pat, oh, ow


def _conv_lrelu_stats_kernel(patches_ref, w_ref, b_ref, stats_ref, *, true_m):
    """Phase 1 (stats only), one M tile: conv matmul + bias + LeakyReLU, then
    per-channel [sum; shifted M2] partials for BatchNorm. No y is stored."""
    i = pl.program_id(0)
    tile_m = patches_ref.shape[0]

    # Conv as im2col matmul: bf16 operands, f32 accumulation on the MXU.
    y = jnp.dot(patches_ref[...], w_ref[...], preferred_element_type=jnp.float32)
    y = y + b_ref[...]
    y = jnp.where(y >= 0.0, y, LEAKY_SLOPE * y)                # LeakyReLU (VPU)

    # Rows past the true M (padding rows, last tile only) are masked out.
    cnt = jnp.minimum(tile_m, true_m - i * tile_m)             # real rows in tile
    valid = jax.lax.broadcasted_iota(jnp.int32, (tile_m, 1), 0) < cnt

    s = jnp.sum(jnp.where(valid, y, 0.0), axis=0, keepdims=True)        # (1, OCp)
    mu = s / cnt.astype(jnp.float32)                                    # tile mean
    d = jnp.where(valid, y - mu, 0.0)
    m2 = jnp.sum(d * d, axis=0, keepdims=True)                          # (1, OCp)
    stats_ref[...] = jnp.concatenate([s, m2], axis=0)[None]             # (1, 2, OCp)


def _conv_lrelu_bn_kernel(patches_ref, w_ref, b_ref, scale_ref, shift_ref, o_ref):
    """Phase 2, one M tile: recompute conv + bias + LeakyReLU, apply the folded
    BatchNorm affine, store the UNPADDED (tile_m, oc) output block."""
    oc = o_ref.shape[-1]
    y = jnp.dot(patches_ref[...], w_ref[...], preferred_element_type=jnp.float32)
    y = y + b_ref[...]
    y = jnp.where(y >= 0.0, y, LEAKY_SLOPE * y)
    o_ref[...] = (y * scale_ref[...] + shift_ref[...])[:, :oc]


@functools.partial(jax.jit, static_argnames=("stride", "padding", "tile_m"))
def conv_block_forward(x, weight, bias, gamma, beta, *, stride, padding, tile_m=1024):
    """Forward of ConvBlock. x: [N, C, H, W] (NCHW, matching PyTorch)."""
    n, c, h, w = x.shape
    oc, _, kh, kw = weight.shape

    # im2col in bf16 (MXU-native; halves streamed patch bytes). K left unpadded.
    patches, oh, ow = _im2col(x.astype(jnp.bfloat16), kh, kw, stride, padding)
    m, k = patches.shape                      # M = N*OH*OW, K = C*KH*KW

    ocp = _round_up(oc, 128)                  # lane-dense resident weight/params
    tile_m = _choose_tile_m(m, tile_m)
    mp = _round_up(m, tile_m)
    num_tiles = mp // tile_m

    patches_p = jnp.pad(patches, ((0, mp - m), (0, 0)))                  # bf16 [Mp, K]
    w_p = jnp.pad(weight.astype(jnp.bfloat16).reshape(oc, k).T,
                  ((0, 0), (0, ocp - oc)))                               # bf16 [K, OCp]
    b_p = jnp.pad(bias.astype(jnp.float32), (0, ocp - oc)).reshape(1, ocp)

    # Tight VMEM request: double-buffered bf16 patch tiles + resident params +
    # the larger of the two phases' (double-buffered) output tiles.
    est = (2 * tile_m * k * 2 + k * ocp * 2 + 3 * ocp * 4
           + max(2 * 2 * ocp * 4, 2 * tile_m * oc * 4))
    vmem_limit = int(min(16 * 2**20, max(2 * 2**20, 4 * est)))

    compiler_params = pltpu.CompilerParams(
        dimension_semantics=("parallel",),     # tiles independent -> megacore OK
        vmem_limit_bytes=vmem_limit)

    flops = 2 * mp * k * ocp
    patch_bytes = patches_p.size * 2 + w_p.size * 2 + ocp * 4

    # ---- Phase 1: per-tile BN partials (sum, shifted M2), stats only --------
    stats = pl.pallas_call(
        functools.partial(_conv_lrelu_stats_kernel, true_m=m),
        out_shape=jax.ShapeDtypeStruct((num_tiles, 2, ocp), jnp.float32),
        grid_spec=pltpu.PrefetchScalarGridSpec(
            num_scalar_prefetch=0,
            grid=(num_tiles,),
            in_specs=[
                pl.BlockSpec((tile_m, k), lambda i: (i, 0)),   # streamed patches
                pl.BlockSpec((k, ocp), lambda i: (0, 0)),      # resident weight
                pl.BlockSpec((1, ocp), lambda i: (0, 0)),      # resident bias
            ],
            out_specs=pl.BlockSpec((1, 2, ocp), lambda i: (i, 0, 0)),
        ),
        compiler_params=compiler_params,
        cost_estimate=pl.CostEstimate(
            flops=flops, transcendentals=0,
            bytes_accessed=patch_bytes + num_tiles * 2 * ocp * 4),
    )(patches_p, w_p, b_p)

    # ---- Finalize per-channel statistics (tiny, plain JAX) ------------------
    counts = jnp.clip(m - jnp.arange(num_tiles) * tile_m, 0, tile_m)
    counts = counts.astype(jnp.float32)[:, None]               # (T, 1)
    sums = stats[:, 0, :]                                      # (T, OCp)
    m2s = stats[:, 1, :]
    mean = jnp.sum(sums, axis=0) / m                           # true M, not padded
    mu_t = sums / counts
    m2_total = jnp.sum(m2s + counts * (mu_t - mean) ** 2, axis=0)
    var = m2_total / m                                         # biased (training BN)
    inv = jax.lax.rsqrt(var + BN_EPS)
    gamma_p = jnp.pad(gamma.astype(jnp.float32), (0, ocp - oc))
    beta_p = jnp.pad(beta.astype(jnp.float32), (0, ocp - oc))
    scale = (gamma_p * inv).reshape(1, ocp)
    shift = (beta_p - mean * gamma_p * inv).reshape(1, ocp)

    # ---- Phase 2: recompute conv+bias+LeakyReLU, normalize, store unpadded --
    out_flat = pl.pallas_call(
        _conv_lrelu_bn_kernel,
        out_shape=jax.ShapeDtypeStruct((mp, oc), jnp.float32),
        grid_spec=pltpu.PrefetchScalarGridSpec(
            num_scalar_prefetch=0,
            grid=(num_tiles,),
            in_specs=[
                pl.BlockSpec((tile_m, k), lambda i: (i, 0)),
                pl.BlockSpec((k, ocp), lambda i: (0, 0)),
                pl.BlockSpec((1, ocp), lambda i: (0, 0)),
                pl.BlockSpec((1, ocp), lambda i: (0, 0)),
                pl.BlockSpec((1, ocp), lambda i: (0, 0)),
            ],
            out_specs=pl.BlockSpec((tile_m, oc), lambda i: (i, 0)),
        ),
        compiler_params=compiler_params,
        cost_estimate=pl.CostEstimate(
            flops=flops, transcendentals=0,
            bytes_accessed=patch_bytes + 2 * ocp * 4 + mp * oc * 4),
    )(patches_p, w_p, b_p, scale, shift)

    # TODO(synk): fuse this slice/reshape/transpose into the phase-2 store.
    out = out_flat[:m].reshape(n, oh, ow, oc)
    return jnp.transpose(out, (0, 3, 1, 2))                    # NHWC -> NCHW


def _reference(x, weight, bias, gamma, beta, *, stride, padding):
    """Precision-matched reference: conv operands in bf16 (same rounding as the
    kernel feeds the MXU), f32 accumulation and f32 everywhere downstream."""
    y = jax.lax.conv_general_dilated(
        x.astype(jnp.bfloat16), weight.astype(jnp.bfloat16),
        window_strides=(stride, stride),
        padding=[(padding, padding), (padding, padding)],
        dimension_numbers=("NCHW", "OIHW", "NCHW"),
        preferred_element_type=jnp.float32)
    y = y + bias[None, :, None, None]
    y = jnp.where(y >= 0.0, y, LEAKY_SLOPE * y)
    mean = jnp.mean(y, axis=(0, 2, 3), keepdims=True)
    var = jnp.var(y, axis=(0, 2, 3), keepdims=True)
    return ((y - mean) * jax.lax.rsqrt(var + BN_EPS)
            * gamma[None, :, None, None] + beta[None, :, None, None])


if __name__ == "__main__":
    # ConvBlock(in_channels=4, out_channels=8, kernel_size=(3,3), stride=1, padding=1)
    N, C, H, W = 2, 4, 16, 16
    OC, KH, KW = 8, 3, 3
    STRIDE, PAD = 1, 1

    key = jax.random.PRNGKey(0)
    kx, kw_, kb, kg, kbeta = jax.random.split(key, 5)
    x = jax.random.normal(kx, (N, C, H, W), dtype=jnp.float32)
    weight = jax.random.normal(kw_, (OC, C, KH, KW), dtype=jnp.float32) * 0.1
    bias = jax.random.normal(kb, (OC,), dtype=jnp.float32) * 0.1
    # PyTorch inits BatchNorm gamma=1, beta=0; randomize slightly to exercise the path.
    gamma = 1.0 + 0.1 * jax.random.normal(kg, (OC,), dtype=jnp.float32)
    beta = 0.1 * jax.random.normal(kbeta, (OC,), dtype=jnp.float32)

    # M = 2*16*16 = 512 rows -> tile_m auto-shrinks to 128 -> 4 grid tiles
    # (exercises the streamed multi-tile path and keeps >= 2 tiles per core).
    out = conv_block_forward(x, weight, bias, gamma, beta, stride=STRIDE, padding=PAD)
    out = jax.block_until_ready(out)

    ref = _reference(x, weight, bias, gamma, beta, stride=STRIDE, padding=PAD)
    assert out.shape == (N, OC, H, W), out.shape
    max_err = float(jnp.max(jnp.abs(out - ref)))
    assert jnp.allclose(out, ref, rtol=2e-3, atol=2e-3), max_err

    print("KERNEL_OK")
</pallas_src>

<mosaic_0001>
module attributes {stable_mosaic.version = 11 : i64} {
  func.func @_conv_lrelu_stats_kernel(%arg0: i32, %arg1: memref<128x36xbf16, #tpu.memory_space<vmem>>, %arg2: memref<36x128xbf16, #tpu.memory_space<vmem>>, %arg3: memref<1x128xf32, #tpu.memory_space<vmem>>, %arg4: memref<1x2x128xf32, #tpu.memory_space<vmem>>) attributes {dimension_semantics = [#tpu.dimension_semantics<parallel>], iteration_bounds = array<i64: 4>, scalar_prefetch = 0 : i64, scratch_operands = 0 : i64, tpu.core_type = #tpu.core_type<tc>, window_params = [{transform_indices = @transform_0, window_bounds = array<i64: 128, 36>}, {pipeline_mode = #tpu.pipeline_mode<synchronous>, transform_indices = @transform_1, window_bounds = array<i64: 36, 128>}, {pipeline_mode = #tpu.pipeline_mode<synchronous>, transform_indices = @transform_2, window_bounds = array<i64: 1, 128>}, {transform_indices = @transform_3, window_bounds = array<i64: 1, 2, 128>}]} {
    %c0 = arith.constant 0 : index
    %c0_0 = arith.constant 0 : index
    %0 = vector.load %arg1[%c0, %c0_0] : memref<128x36xbf16, #tpu.memory_space<vmem>>, vector<128x36xbf16>
    %c0_1 = arith.constant 0 : index
    %c0_2 = arith.constant 0 : index
    %1 = vector.load %arg2[%c0_1, %c0_2] : memref<36x128xbf16, #tpu.memory_space<vmem>>, vector<36x128xbf16>
    %cst = arith.constant dense<0.000000e+00> : vector<128x128xf32>
    %2 = tpu.matmul %0, %1, %cst {dimension_numbers = #tpu.dot_dimension_numbers<[1], [0], [0], [1], [0, 0, 1, 1], [], []>} : vector<128x36xbf16>, vector<36x128xbf16>, vector<128x128xf32> -> vector<128x128xf32>
    %c0_3 = arith.constant 0 : index
    %c0_4 = arith.constant 0 : index
    %3 = vector.load %arg3[%c0_3, %c0_4] : memref<1x128xf32, #tpu.memory_space<vmem>>, vector<1x128xf32>
    %4 = vector.broadcast %3 : vector<1x128xf32> to vector<128x128xf32>
    %5 = arith.addf %2, %4 : vector<128x128xf32>
    %cst_5 = arith.constant 0.000000e+00 : f32
    %6 = vector.broadcast %cst_5 : f32 to vector<128x128xf32>
    %7 = arith.cmpf oge, %5, %6 : vector<128x128xf32>
    %cst_6 = arith.constant 0.00999999977 : f32
    %8 = vector.broadcast %cst_6 : f32 to vector<128x128xf32>
    %9 = arith.mulf %8, %5 : vector<128x128xf32>
    %10 = arith.select %7, %5, %9 : vector<128x128xi1>, vector<128x128xf32>
    %c128_i32 = arith.constant 128 : i32
    %11 = arith.muli %arg0, %c128_i32 : i32
    %c512_i32 = arith.constant 512 : i32
    %12 = arith.subi %c512_i32, %11 : i32
    %c128_i32_7 = arith.constant 128 : i32
    %13 = arith.minsi %c128_i32_7, %12 : i32
    %14 = tpu.iota {dimensions = array<i32: 0>} : vector<128x1xi32>
    %15 = vector.broadcast %13 : i32 to vector<128x1xi32>
    %16 = arith.cmpi slt, %14, %15 : vector<128x1xi32>
    %cst_8 = arith.constant 0.000000e+00 : f32
    %17 = vector.shape_cast %16 : vector<128x1xi1> to vector<128x1xi1>
    %18 = vector.broadcast %17 : vector<128x1xi1> to vector<128x128xi1>
    %19 = vector.broadcast %cst_8 : f32 to vector<128x128xf32>
    %20 = arith.select %18, %10, %19 : vector<128x128xi1>, vector<128x128xf32>
    %cst_9 = arith.constant dense<0.000000e+00> : vector<128xf32>
    %21 = vector.multi_reduction <add>, %20, %cst_9 [0] : vector<128x128xf32> to vector<128xf32>
    %22 = vector.shape_cast %21 : vector<128xf32> to vector<1x128xf32>
    %23 = arith.sitofp %13 : i32 to f32
    %24 = vector.broadcast %23 : f32 to vector<1x128xf32>
    %25 = arith.divf %22, %24 : vector<1x128xf32>
    %26 = vector.broadcast %25 : vector<1x128xf32> to vector<128x128xf32>
    %27 = arith.subf %10, %26 : vector<128x128xf32>
    %cst_10 = arith.constant 0.000000e+00 : f32
    %28 = vector.shape_cast %16 : vector<128x1xi1> to vector<128x1xi1>
    %29 = vector.broadcast %28 : vector<128x1xi1> to vector<128x128xi1>
    %30 = vector.broadcast %cst_10 : f32 to vector<128x128xf32>
    %31 = arith.select %29, %27, %30 : vector<128x128xi1>, vector<128x128xf32>
    %32 = arith.mulf %31, %31 : vector<128x128xf32>
    %cst_11 = arith.constant dense<0.000000e+00> : vector<128xf32>
    %33 = vector.multi_reduction <add>, %32, %cst_11 [0] : vector<128x128xf32> to vector<128xf32>
    %34 = vector.shape_cast %33 : vector<128xf32> to vector<1x128xf32>
    %35 = tpu.concatenate %22, %34 in 0 : vector<1x128xf32>, vector<1x128xf32> -> vector<2x128xf32>
    %36 = vector.shape_cast %35 : vector<2x128xf32> to vector<1x2x128xf32>
    %c0_12 = arith.constant 0 : index
    %c0_13 = arith.constant 0 : index
    %c0_14 = arith.constant 0 : index
    %37 = vector.load %arg4[%c0_12, %c0_13, %c0_14] : memref<1x2x128xf32, #tpu.memory_space<vmem>>, vector<1x2x128xf32>
    tpu.vector_store %arg4[%c0_12, %c0_13, %c0_14], %36 {strides = array<i32>} : memref<1x2x128xf32, #tpu.memory_space<vmem>>, vector<1x2x128xf32>,
    return
  }
  func.func @transform_0(%arg0: i32) -> (i32, i32) {
    %c0_i32 = arith.constant 0 : i32
    %c0_i32_0 = arith.constant 0 : i32
    return %arg0, %c0_i32 : i32, i32
  }
  func.func @transform_1(%arg0: i32) -> (i32, i32) {
    %c0_i32 = arith.constant 0 : i32
    %c0_i32_0 = arith.constant 0 : i32
    %c0_i32_1 = arith.constant 0 : i32
    return %c0_i32, %c0_i32_0 : i32, i32
  }
  func.func @transform_2(%arg0: i32) -> (i32, i32) {
    %c0_i32 = arith.constant 0 : i32
    %c0_i32_0 = arith.constant 0 : i32
    %c0_i32_1 = arith.constant 0 : i32
    return %c0_i32, %c0_i32_0 : i32, i32
  }
  func.func @transform_3(%arg0: i32) -> (i32, i32, i32) {
    %c0_i32 = arith.constant 0 : i32
    %c0_i32_0 = arith.constant 0 : i32
    %c0_i32_1 = arith.constant 0 : i32
    return %arg0, %c0_i32, %c0_i32_0 : i32, i32, i32
  }
}

module attributes {stable_mosaic.version = 11 : i64} {
  func.func @_conv_lrelu_bn_kernel(%arg0: i32, %arg1: memref<128x36xbf16, #tpu.memory_space<vmem>>, %arg2: memref<36x128xbf16, #tpu.memory_space<vmem>>, %arg3: memref<1x128xf32, #tpu.memory_space<vmem>>, %arg4: memref<1x128xf32, #tpu.memory_space<vmem>>, %arg5: memref<1x128xf32, #tpu.memory_space<vmem>>, %arg6: memref<128x8xf32, #tpu.memory_space<vmem>>) attributes {dimension_semantics = [#tpu.dimension_semantics<parallel>], iteration_bounds = array<i64: 4>, scalar_prefetch = 0 : i64, scratch_operands = 0 : i64, tpu.core_type = #tpu.core_type<tc>, window_params = [{transform_indices = @transform_0, window_bounds = array<i64: 128, 36>}, {pipeline_mode = #tpu.pipeline_mode<synchronous>, transform_indices = @transform_1, window_bounds = array<i64: 36, 128>}, {pipeline_mode = #tpu.pipeline_mode<synchronous>, transform_indices = @transform_2, window_bounds = array<i64: 1, 128>}, {pipeline_mode = #tpu.pipeline_mode<synchronous>, transform_indices = @transform_3, window_bounds = array<i64: 1, 128>}, {pipeline_mode = #tpu.pipeline_mode<synchronous>, transform_indices = @transform_4, window_bounds = array<i64: 1, 128>}, {transform_indices = @transform_5, window_bounds = array<i64: 128, 8>}]} {
    %c0 = arith.constant 0 : index
    %c0_0 = arith.constant 0 : index
    %0 = vector.load %arg1[%c0, %c0_0] : memref<128x36xbf16, #tpu.memory_space<vmem>>, vector<128x36xbf16>
    %c0_1 = arith.constant 0 : index
    %c0_2 = arith.constant 0 : index
    %1 = vector.load %arg2[%c0_1, %c0_2] : memref<36x128xbf16, #tpu.memory_space<vmem>>, vector<36x128xbf16>
    %cst = arith.constant dense<0.000000e+00> : vector<128x128xf32>
    %2 = tpu.matmul %0, %1, %cst {dimension_numbers = #tpu.dot_dimension_numbers<[1], [0], [0], [1], [0, 0, 1, 1], [], []>} : vector<128x36xbf16>, vector<36x128xbf16>, vector<128x128xf32> -> vector<128x128xf32>
    %c0_3 = arith.constant 0 : index
    %c0_4 = arith.constant 0 : index
    %3 = vector.load %arg3[%c0_3, %c0_4] : memref<1x128xf32, #tpu.memory_space<vmem>>, vector<1x128xf32>
    %4 = vector.broadcast %3 : vector<1x128xf32> to vector<128x128xf32>
    %5 = arith.addf %2, %4 : vector<128x128xf32>
    %cst_5 = arith.constant 0.000000e+00 : f32
    %6 = vector.broadcast %cst_5 : f32 to vector<128x128xf32>
    %7 = arith.cmpf oge, %5, %6 : vector<128x128xf32>
    %cst_6 = arith.constant 0.00999999977 : f32
    %8 = vector.broadcast %cst_6 : f32 to vector<128x128xf32>
    %9 = arith.mulf %8, %5 : vector<128x128xf32>
    %10 = arith.select %7, %5, %9 : vector<128x128xi1>, vector<128x128xf32>
    %c0_7 = arith.constant 0 : index
    %c0_8 = arith.constant 0 : index
    %11 = vector.load %arg4[%c0_7, %c0_8] : memref<1x128xf32, #tpu.memory_space<vmem>>, vector<1x128xf32>
    %12 = vector.broadcast %11 : vector<1x128xf32> to vector<128x128xf32>
    %13 = arith.mulf %10, %12 : vector<128x128xf32>
    %c0_9 = arith.constant 0 : index
    %c0_10 = arith.constant 0 : index
    %14 = vector.load %arg5[%c0_9, %c0_10] : memref<1x128xf32, #tpu.memory_space<vmem>>, vector<1x128xf32>
    %15 = vector.broadcast %14 : vector<1x128xf32> to vector<128x128xf32>
    %16 = arith.addf %13, %15 : vector<128x128xf32>
    %17 = vector.extract_strided_slice %16 {offsets = [0, 0], sizes = [128, 8], strides = [1, 1]} : vector<128x128xf32> to vector<128x8xf32>
    %c0_11 = arith.constant 0 : index
    %c0_12 = arith.constant 0 : index
    %18 = vector.load %arg6[%c0_11, %c0_12] : memref<128x8xf32, #tpu.memory_space<vmem>>, vector<128x8xf32>
    tpu.vector_store %arg6[%c0_11, %c0_12], %17 {strides = array<i32>} : memref<128x8xf32, #tpu.memory_space<vmem>>, vector<128x8xf32>,
    return
  }
  func.func @transform_0(%arg0: i32) -> (i32, i32) {
    %c0_i32 = arith.constant 0 : i32
    %c0_i32_0 = arith.constant 0 : i32
    return %arg0, %c0_i32 : i32, i32
  }
  func.func @transform_1(%arg0: i32) -> (i32, i32) {
    %c0_i32 = arith.constant 0 : i32
    %c0_i32_0 = arith.constant 0 : i32
    %c0_i32_1 = arith.constant 0 : i32
    return %c0_i32, %c0_i32_0 : i32, i32
  }
  func.func @transform_2(%arg0: i32) -> (i32, i32) {
    %c0_i32 = arith.constant 0 : i32
    %c0_i32_0 = arith.constant 0 : i32
    %c0_i32_1 = arith.constant 0 : i32
    return %c0_i32, %c0_i32_0 : i32, i32
  }
  func.func @transform_3(%arg0: i32) -> (i32, i32) {
    %c0_i32 = arith.constant 0 : i32
    %c0_i32_0 = arith.constant 0 : i32
    %c0_i32_1 = arith.constant 0 : i32
    return %c0_i32, %c0_i32_0 : i32, i32
  }
  func.func @transform_4(%arg0: i32) -> (i32, i32) {
    %c0_i32 = arith.constant 0 : i32
    %c0_i32_0 = arith.constant 0 : i32
    %c0_i32_1 = arith.constant 0 : i32
    return %c0_i32, %c0_i32_0 : i32, i32
  }
  func.func @transform_5(%arg0: i32) -> (i32, i32) {
    %c0_i32 = arith.constant 0 : i32
    %c0_i32_0 = arith.constant 0 : i32
    return %arg0, %c0_i32 : i32, i32
  }
}

</mosaic_0001>

<bundles_post_ra>
// kernel: conv_block_forward.3
= control target key start
LH: loop header
LB: loop body
LE: loop exit
PB: predicated region body
PF: predicated region fallthrough
CT: control target
= control target key end

     0   :  { %s736_s18 = smov 0   ;;  %s871_s0 = inlined_call_operand.vmem [shape: bf16[512,36], index: 0, kind: input, shape index: {}]   ;;  %s872_s1 = inlined_call_operand.vmem [shape: bf16[36,128], index: 1, kind: input, shape index: {}]   ;;  %s873_s2 = inlined_call_operand.vmem [shape: f32[1,128], index: 2, kind: input, shape index: {}]   ;;  %s874_s3 = inlined_call_operand.vmem [shape: f32[1,128], index: 3, kind: input, shape index: {}]   ;;  %s875_s4 = inlined_call_operand.vmem [shape: f32[1,128], index: 4, kind: input, shape index: {}]   ;;  %s876_s5 = inlined_call_operand.vmem [shape: f32[512,8], index: 5, kind: output, shape index: {}]  }
   0x1 LB: > { %s605_s19 = sadd.s32 4294967295, %s704_s18   ;;  %p609_p0 = scmp.ge.s32.totalorder %s704_s18, 1  ;;  %s704_s18 = sphi %s736_s18, %s15_s18  }
   0x2   : > { %p188_p1 = scmp.lt.s32.totalorder %s704_s18, 5 }
   0x4   : > { %p189_p2 = pnand %p609_p0, %p188_p1 }
   0x5   : > { %v687_v0 = vld [vmem:[%s872_s1] sm:$0xff] (!%p189_p2)   ;;  %v688_v1 = vld [vmem:[%s872_s1 + $0x8] sm:$0xff] (!%p189_p2)   ;;  %s610_s24 = sshll.u32 (!%p189_p2), %s605_s19, 4  ;;  %v689_v2 = vld [vmem:[%s872_s1 + $0x10] ss:$0 sps:$4 sm:$0x33] (!%p189_p2)  }
   0x6   : > { %192 = sbr.rel (%p189_p2) target bundleno = 260 (0x104), region = 40  ;;  %649 = vmatprep.subr.bf16.mxu0 (!%p189_p2), %v687_v0  ;;  %671 = vmatprep.subr.bf16.mxu1 (!%p189_p2), %v687_v0  ;;  %p217_p3 = scmp.lt.s32.totalorder (!%p189_p2), %s610_s24, 63  ;;  %vm337_vm0 = vcmask (!%p189_p2), 1041408   ;;  %vm312_vm1 = vcmask (!%p189_p2), 293888   ;;  %v770_v12 = vld [vmem:[%s873_s2] ss:$0 sm:$0xff] (!%p189_p2) }
   0x7   : > { %650 = vmatpush3.bf16.msra.mxu0 (!%p189_p2), %v687_v0  ;;  %674 = vmatpush3.bf16.msra.mxu1 (!%p189_p2), %v687_v0  ;;  %v339_v3 = vsel (!%p189_p2), %vm337_vm0, %v689_v2, 0  ;;  %v778_v19 = vld [vmem:[%s874_s3] ss:$0 sm:$0xff] (!%p189_p2)  ;;  %vm532_vm2 = vcmask (!%p189_p2), 64512  }
   0x8   : > { %651 = vmatprep.subr.bf16.mxu0 (!%p189_p2), %v688_v1  ;;  %672 = vmatprep.subr.bf16.mxu1 (!%p189_p2), %v688_v1  ;;  %v785_v29 = vld [vmem:[%s875_s4] ss:$0 sm:$0xff] (!%p189_p2) }
   0xb   : > { %652 = vmatpush3.bf16.msra.mxu0 (!%p189_p2), %v688_v1  ;;  %675 = vmatpush3.bf16.msra.mxu1 (!%p189_p2), %v688_v1 }
   0xc   : > { %677 = vmatprep.subr.msk.bf16.mxu0 (!%p189_p2), %vm337_vm0, %v689_v2  ;;  %678 = vmatprep.subr.msk.bf16.mxu1 (!%p189_p2), %vm337_vm0, %v689_v2 }
   0xd   : > { %s878_s24 = smov (!%p217_p3, %s610_s24), 63 }
   0xe   : > { %s611_s27 = sshll.u32 %s878_s24, 2  ;;  %s613_s8 = sshll.u32 %s878_s24, 3 }
   0xf   : > { %s220_s30 = scalar_lea.vmem %s871_s0, %s611_s27  ;;  %654 = vmatpush3.bf16.msra.mxu0 %v339_v3  ;;  %676 = vmatpush3.bf16.msra.mxu1 %v339_v3  ;;  %s794_s15 = scalar_lea.vmem %s876_s5, %s613_s8 }
  0x10   : > { %v690_v4 = vld [vmem:[%s220_s30] sm:$0xff]   ;;  %v692_v6 = vld [vmem:[%s220_s30 + $0x8] sm:$0xff]   ;;  %v694_v8 = vld [vmem:[%s220_s30 + $0x10] sm:$0xff]  }
  0x11   : > { %v691_v5 = vld [vmem:[%s220_s30 + $0x20] sm:$0xff]   ;;  %655 = vmatprep.mubr.msk.bf16.mxu0 %vm312_vm1, %v690_v4  ;;  %v693_v7 = vld [vmem:[%s220_s30 + $0x28] sm:$0xff]   ;;  %v695_v9 = vld [vmem:[%s220_s30 + $0x30] sm:$0xff]  }
  0x12   : > { %663 = vmatprep.mubr.msk.bf16.mxu1 %vm312_vm1, %v691_v5  ;;  %656 = vmatmul.mubr.msk.bf16.vlgmr.msra.gmra.mrb[0].mxu0 %vm312_vm1, %v692_v6  ;;  %v696_v10 = vld [vmem:[%s220_s30 + $0x18] sm:$0xff]  }
  0x13   : > { %664 = vmatmul.mubr.msk.bf16.vlgmr.msra.gmra.mrb[0].mxu1 %vm312_vm1, %v693_v7  ;;  %659 = vmatprep.mubr.msk.bf16.mxu0 %vm312_vm1, %v694_v8  ;;  %v697_v11 = vld [vmem:[%s220_s30 + $0x38] sm:$0xff]  }
  0x14   : > { %667 = vmatprep.mubr.msk.bf16.mxu1 %vm312_vm1, %v695_v9 }
  0x1a   : > { %660 = vmatmul.mubr.msk.bf16.gmra.mrb[4].mxu0 %vm312_vm1, %v696_v10 }
  0x1b   : > { %668 = vmatmul.mubr.msk.bf16.gmra.mrb[4].mxu1 %vm312_vm1, %v697_v11 }
  0xe5   : > { %v657_v13 = vpop.f32.mrb[0].mxu0 }
  0xe6   : > { %v665_v14 = vpop.f32.mrb[0].mxu1  ;;  %v384_v15 = vadd.f32 %v657_v13, %v770_v12  ;;  %v375_v17 = vpop.f32.mrb[1].mxu0 }
  0xe7   : > { %v416_v16 = vadd.f32 %v665_v14, %v770_v12  ;;  %v407_v18 = vpop.f32.mrb[1].mxu1  ;;  %v376_v20 = vadd.f32 %v770_v12, %v375_v17  ;;  %v658_v22 = vpop.f32.mrb[2].mxu0 }
  0xe8   : > { %v408_v21 = vadd.f32 %v770_v12, %v407_v18  ;;  %v666_v23 = vpop.f32.mrb[2].mxu1  ;;  %vm440_vm3 = vcmp.ge.f32.partialorder %v384_v15, 0.0  ;;  %v456_v24 = vmul.f32 0.01, %v384_v15  ;;  %v387_v31 = vadd.f32 %v658_v22, %v770_v12  ;;  %v378_v33 = vpop.f32.mrb[3].mxu0 }
  0xe9   : > { %vm448_vm4 = vcmp.ge.f32.partialorder %v416_v16, 0.0  ;;  %v464_v25 = vmul.f32 0.01, %v416_v16  ;;  %vm438_vm5 = vcmp.ge.f32.partialorder %v376_v20, 0.0  ;;  %v454_v26 = vmul.f32 0.01, %v376_v20 }
  0xea   : > { %vm446_vm6 = vcmp.ge.f32.partialorder %v408_v21, 0.0  ;;  %v462_v27 = vmul.f32 0.01, %v408_v21  ;;  %v472_v28 = vsel %vm440_vm3, %v384_v15, %v456_v24  ;;  %v419_v32 = vadd.f32 %v666_v23, %v770_v12  ;;  %v410_v34 = vpop.f32.mrb[3].mxu1 }
  0xeb   : > { %v480_v30 = vsel %vm448_vm4, %v416_v16, %v464_v25  ;;  %v495_v35 = vmul.f32 %v778_v19, %v472_v28  ;;  %v470_v37 = vsel %vm438_vm5, %v376_v20, %v454_v26  ;;  %vm441_vm7 = vcmp.ge.f32.partialorder %v387_v31, 0.0 }
  0xec   : > { %v503_v36 = vmul.f32 %v778_v19, %v480_v30  ;;  %v478_v38 = vsel %vm446_vm6, %v408_v21, %v462_v27  ;;  %v493_v39 = vmul.f32 %v778_v19, %v470_v37  ;;  %v457_v41 = vmul.f32 0.01, %v387_v31 }
  0xed   : > { %v501_v40 = vmul.f32 %v778_v19, %v478_v38  ;;  %v518_v42 = vadd.f32 %v785_v29, %v495_v35  ;;  %vm449_vm8 = vcmp.ge.f32.partialorder %v419_v32, 0.0  ;;  %v465_v44 = vmul.f32 0.01, %v419_v32  ;;  %v661_v45 = vpop.f32.mrb[4].mxu0 }
  0xee   : > { %v526_v43 = vadd.f32 %v785_v29, %v503_v36  ;;  %v669_v46 = vpop.f32.mrb[4].mxu1  ;;  %v516_v47 = vadd.f32 %v785_v29, %v493_v39  ;;  %v473_v49 = vsel %vm441_vm7, %v387_v31, %v457_v41  ;;  %v379_v50 = vadd.f32 %v770_v12, %v378_v33  ;;  %v391_v51 = vpop.f32.mrb[5].mxu0 }
  0xef   : > { %v524_v48 = vadd.f32 %v785_v29, %v501_v40  ;;  %v423_v52 = vpop.f32.mrb[5].mxu1  ;;  %535 = vst.msk [vmem:[%s794_s15 + $0x10] sm:$0xff] %vm532_vm2, %v518_v42  ;;  %v496_v53 = vmul.f32 %v778_v19, %v473_v49  ;;  %v481_v54 = vsel %vm449_vm8, %v419_v32, %v465_v44  ;;  %v411_v55 = vadd.f32 %v770_v12, %v410_v34  ;;  %v662_v57 = vpop.f32.mrb[6].mxu0 }
  0xf0   : > { %543 = vst.msk [vmem:[%s794_s15 + $0x50] sm:$0xff] %vm532_vm2, %v526_v43  ;;  %v400_v56 = vadd.f32 %v661_v45, %v770_v12  ;;  %v670_v58 = vpop.f32.mrb[6].mxu1  ;;  %533 = vst.msk [vmem:[%s794_s15] sm:$0xff] %vm532_vm2, %v516_v47  ;;  %v504_v59 = vmul.f32 %v778_v19, %v481_v54  ;;  %vm439_vm9 = vcmp.ge.f32.partialorder %v379_v50, 0.0  ;;  %v455_v60 = vmul.f32 0.01, %v379_v50 }
  0xf1   : > { %541 = vst.msk [vmem:[%s794_s15 + $0x40] sm:$0xff] %vm532_vm2, %v524_v48  ;;  %v432_v61 = vadd.f32 %v669_v46, %v770_v12  ;;  %v394_v62 = vpop.f32.mrb[7].mxu0  ;;  %v426_v63 = vpop.f32.mrb[7].mxu1  ;;  %v519_v0 = vadd.f32 %v785_v29, %v496_v53  ;;  %vm447_vm10 = vcmp.ge.f32.partialorder %v411_v55, 0.0  ;;  %v463_v1 = vmul.f32 0.01, %v411_v55 }
  0xf2   : > { %vm444_vm11 = vcmp.ge.f32.partialorder %v400_v56, 0.0  ;;  %v527_v2 = vadd.f32 %v785_v29, %v504_v59  ;;  %v471_v3 = vsel %vm439_vm9, %v379_v50, %v455_v60  ;;  %v460_v4 = vmul.f32 0.01, %v400_v56 }
  0xf3   : > { %vm452_vm12 = vcmp.ge.f32.partialorder %v432_v61, 0.0  ;;  %536 = vst.msk [vmem:[%s794_s15 + $0x18] sm:$0xff] %vm532_vm2, %v519_v0  ;;  %v494_v5 = vmul.f32 %v778_v19, %v471_v3  ;;  %v479_v6 = vsel %vm447_vm10, %v411_v55, %v463_v1  ;;  %v468_v7 = vmul.f32 0.01, %v432_v61 }
  0xf4   : > { %v392_v8 = vadd.f32 %v770_v12, %v391_v51  ;;  %544 = vst.msk [vmem:[%s794_s15 + $0x58] sm:$0xff] %vm532_vm2, %v527_v2  ;;  %v502_v9 = vmul.f32 %v778_v19, %v479_v6  ;;  %v476_v10 = vsel %vm444_vm11, %v400_v56, %v460_v4  ;;  %v424_v11 = vadd.f32 %v770_v12, %v423_v52 }
  0xf5   : > { %v403_v13 = vadd.f32 %v662_v57, %v770_v12  ;;  %v517_v14 = vadd.f32 %v785_v29, %v494_v5  ;;  %v499_v15 = vmul.f32 %v778_v19, %v476_v10  ;;  %v484_v16 = vsel %vm452_vm12, %v432_v61, %v468_v7 }
  0xf6   : > { %vm442_vm13 = vcmp.ge.f32.partialorder %v392_v8, 0.0  ;;  %v525_v17 = vadd.f32 %v785_v29, %v502_v9  ;;  %v507_v18 = vmul.f32 %v778_v19, %v484_v16  ;;  %v458_v20 = vmul.f32 0.01, %v392_v8 }
  0xf7   : > { %vm450_vm14 = vcmp.ge.f32.partialorder %v424_v11, 0.0  ;;  %534 = vst.msk [vmem:[%s794_s15 + $0x8] sm:$0xff] %vm532_vm2, %v517_v14  ;;  %v522_v21 = vadd.f32 %v785_v29, %v499_v15  ;;  %v466_v22 = vmul.f32 0.01, %v424_v11  ;;  %vm445_vm15 = vcmp.ge.f32.partialorder %v403_v13, 0.0 }
  0xf8   : > { %v461_v23 = vmul.f32 0.01, %v403_v13  ;;  %542 = vst.msk [vmem:[%s794_s15 + $0x48] sm:$0xff] %vm532_vm2, %v525_v17  ;;  %v530_v24 = vadd.f32 %v785_v29, %v507_v18  ;;  %v474_v25 = vsel %vm442_vm13, %v392_v8, %v458_v20  ;;  %v435_v26 = vadd.f32 %v670_v58, %v770_v12 }
  0xf9   : > { %v395_v27 = vadd.f32 %v770_v12, %v394_v62  ;;  %539 = vst.msk [vmem:[%s794_s15 + $0x30] sm:$0xff] %vm532_vm2, %v522_v21  ;;  %v497_v28 = vmul.f32 %v778_v19, %v474_v25  ;;  %v482_v30 = vsel %vm450_vm14, %v424_v11, %v466_v22  ;;  %v427_v32 = vadd.f32 %v770_v12, %v426_v63 }
  0xfa   : > { %v477_v31 = vsel %vm445_vm15, %v403_v13, %v461_v23  ;;  %547 = vst.msk [vmem:[%s794_s15 + $0x70] sm:$0xff] %vm532_vm2, %v530_v24  ;;  %v505_v33 = vmul.f32 %v778_v19, %v482_v30  ;;  %vm453_vm0 = vcmp.ge.f32.partialorder %v435_v26, 0.0  ;;  %v469_v35 = vmul.f32 0.01, %v435_v26 }
  0xfb   : > { %v500_v34 = vmul.f32 %v778_v19, %v477_v31  ;;  %v520_v36 = vadd.f32 %v785_v29, %v497_v28  ;;  %vm443_vm1 = vcmp.ge.f32.partialorder %v395_v27, 0.0  ;;  %v459_v37 = vmul.f32 0.01, %v395_v27 }
  0xfc   : > { %vm451_vm3 = vcmp.ge.f32.partialorder %v427_v32, 0.0  ;;  %v528_v38 = vadd.f32 %v785_v29, %v505_v33  ;;  %v485_v39 = vsel %vm453_vm0, %v435_v26, %v469_v35  ;;  %v467_v40 = vmul.f32 0.01, %v427_v32 }
  0xfd   : > { %v523_v12 = vadd.f32 %v785_v29, %v500_v34  ;;  %537 = vst.msk [vmem:[%s794_s15 + $0x20] sm:$0xff] %vm532_vm2, %v520_v36  ;;  %v508_v41 = vmul.f32 %v778_v19, %v485_v39  ;;  %v475_v42 = vsel %vm443_vm1, %v395_v27, %v459_v37 }
  0xfe   : > { %545 = vst.msk [vmem:[%s794_s15 + $0x60] sm:$0xff] %vm532_vm2, %v528_v38  ;;  %v498_v43 = vmul.f32 %v778_v19, %v475_v42  ;;  %v483_v44 = vsel %vm451_vm3, %v427_v32, %v467_v40 }
  0xff   : > { %540 = vst.msk [vmem:[%s794_s15 + $0x38] sm:$0xff] %vm532_vm2, %v523_v12  ;;  %v531_v45 = vadd.f32 %v785_v29, %v508_v41  ;;  %v506_v46 = vmul.f32 %v778_v19, %v483_v44 }
 0x100   : > { %v521_v47 = vadd.f32 %v785_v29, %v498_v43 }
 0x101   : > { %548 = vst.msk [vmem:[%s794_s15 + $0x78] sm:$0xff] %vm532_vm2, %v531_v45  ;;  %v529_v48 = vadd.f32 %v785_v29, %v506_v46 }
 0x102   : > { %538 = vst.msk [vmem:[%s794_s15 + $0x28] sm:$0xff] %vm532_vm2, %v521_v47 }
 0x103   : > { %546 = vst.msk [vmem:[%s794_s15 + $0x68] sm:$0xff] %vm532_vm2, %v529_v48 }
 0x104 PF: > { %s15_s18 = sadd.s32 1, %s704_s18  }
 0x105   : > { %p12_p4 = scmp.ge.s32.totalorder %s15_s18, 6  }
 0x107   :  { %14 = sbr.rel (!%p12_p4) target bundleno = 1 (0x1), region = 70 }

// kernel: conv_block_forward.2
= control target key start
LH: loop header
LB: loop body
LE: loop exit
PB: predicated region body
PF: predicated region fallthrough
CT: control target
= control target key end

     0   :  { %s786_s12 = smov 0   ;;  %s1108_s0 = inlined_call_operand.vmem [shape: bf16[512,36], index: 0, kind: input, shape index: {}]   ;;  %s1109_s1 = inlined_call_operand.vmem [shape: bf16[36,128], index: 1, kind: input, shape index: {}]   ;;  %s1110_s2 = inlined_call_operand.vmem [shape: f32[1,128], index: 2, kind: input, shape index: {}]   ;;  %s1111_s3 = inlined_call_operand.vmem [shape: f32[4,2,128], index: 3, kind: output, shape index: {}]  }
   0x1 LB: > { %s792_s13 = sadd.s32 4294967295, %s764_s12   ;;  %p669_p0 = scmp.ge.s32.totalorder %s764_s12, 1  ;;  %s764_s12 = sphi %s786_s12, %s13_s12  }
   0x2   : > { %p138_p1 = scmp.lt.s32.totalorder %s764_s12, 5 }
   0x4   : > { %p139_p2 = pnand %p669_p0, %p138_p1 }
   0x5   : > { %v745_v0 = vld [vmem:[%s1109_s1] sm:$0xff] (!%p139_p2)   ;;  %v746_v1 = vld [vmem:[%s1109_s1 + $0x8] sm:$0xff] (!%p139_p2)   ;;  %s670_s18 = sshll.u32 (!%p139_p2), %s792_s13, 4  ;;  %v747_v2 = vld [vmem:[%s1109_s1 + $0x10] ss:$0 sps:$4 sm:$0x33] (!%p139_p2)   ;;  %v433_v12 = vlaneseq (!%p139_p2) }
   0x6   : > { %142 = sbr.rel (%p139_p2) target bundleno = 334 (0x14e), region = 32  ;;  %707 = vmatprep.subr.bf16.mxu0 (!%p139_p2), %v745_v0  ;;  %729 = vmatprep.subr.bf16.mxu1 (!%p139_p2), %v745_v0  ;;  %p162_p3 = scmp.lt.s32.totalorder (!%p139_p2), %s670_s18, 63  ;;  %vm280_vm0 = vcmask (!%p139_p2), 1041408   ;;  %vm255_vm1 = vcmask (!%p139_p2), 293888   ;;  %v821_v13 = vld [vmem:[%s1110_s2] ss:$0 sm:$0xff] (!%p139_p2) }
   0x7   : > { %708 = vmatpush3.bf16.msra.mxu0 (!%p139_p2), %v745_v0  ;;  %732 = vmatpush3.bf16.msra.mxu1 (!%p139_p2), %v745_v0  ;;  %v282_v3 = vsel (!%p139_p2), %vm280_vm0, %v747_v2, 0  ;;  %s693_s25 = sshll.u32 (!%p139_p2), %s792_s13, 7  ;;  %v825_v14 = vshrl.u32 (!%p139_p2), %v433_v12, 7  ;;  %p167_p5 = scmp.lt.s32.totalorder (!%p139_p2), %s792_s13, 3 }
   0x8   : > { %709 = vmatprep.subr.bf16.mxu0 (!%p139_p2), %v746_v1  ;;  %730 = vmatprep.subr.bf16.mxu1 (!%p139_p2), %v746_v1  ;;  %s430_s26 = ssub.s32 (!%p139_p2), 512, %s693_s25 }
   0x9   : > { %p431_p4 = scmp.lt.s32.totalorder (!%p139_p2), %s430_s26, 128  ;;  %v829_v18 = vadd.s32 (!%p139_p2), 8, %v825_v14  ;;  %v838_v24 = vadd.s32 (!%p139_p2), 16, %v825_v14  ;;  %v842_v26 = vadd.s32 (!%p139_p2), 24, %v825_v14  ;;  %v854_v36 = vadd.s32 (!%p139_p2), 32, %v825_v14 }
   0xa   : > { %v874_v44 = vadd.s32 (!%p139_p2), 40, %v825_v14  ;;  %v881_v48 = vadd.s32 (!%p139_p2), 48, %v825_v14  ;;  %v892_v54 = vadd.s32 (!%p139_p2), 56, %v825_v14 }
   0xb   : > { %710 = vmatpush3.bf16.msra.mxu0 (!%p139_p2), %v746_v1  ;;  %733 = vmatpush3.bf16.msra.mxu1 (!%p139_p2), %v746_v1 }
   0xc   : > { %735 = vmatprep.subr.msk.bf16.mxu0 (!%p139_p2), %vm280_vm0, %v747_v2  ;;  %736 = vmatprep.subr.msk.bf16.mxu1 (!%p139_p2), %vm280_vm0, %v747_v2 }
   0xd   : > { %s1117_s18 = smov (!%p162_p3, %s670_s18), 63  ;;  %s1119_s26 = smov (!%p431_p4, %s430_s26), 128 }
   0xe   : > { %s671_s21 = sshll.u32 %s1117_s18, 2  ;;  %v834_v20 = vstv %s1119_s26  ;;  %s536_s29 = scvt.s32.f32 %s1119_s26 }
   0xf   : > { %s165_s24 = scalar_lea.vmem %s1108_s0, %s671_s21  ;;  %712 = vmatpush3.bf16.msra.mxu0 %v282_v3  ;;  %734 = vmatpush3.bf16.msra.mxu1 %v282_v3  ;;  %vm451_vm4 = vcmp.lt.s32.totalorder %v825_v14, %v834_v20  ;;  %vm452_vm5 = vcmp.lt.s32.totalorder %v829_v18, %v834_v20  ;;  %vm453_vm8 = vcmp.lt.s32.totalorder %v838_v24, %v834_v20  ;;  %s1121_s13 = smov (!%p167_p5, %s792_s13), 3 }
  0x10   : > { %v748_v4 = vld [vmem:[%s165_s24] sm:$0xff]   ;;  %v749_v5 = vld [vmem:[%s165_s24 + $0x8] sm:$0xff]   ;;  %v750_v6 = vld [vmem:[%s165_s24 + $0x10] sm:$0xff]   ;;  %vm454_vm9 = vcmp.lt.s32.totalorder %v842_v26, %v834_v20  ;;  %vm455_vm10 = vcmp.lt.s32.totalorder %v854_v36, %v834_v20  ;;  %vm456_vm12 = vcmp.lt.s32.totalorder %v874_v44, %v834_v20  ;;  %vm457_vm15 = vcmp.lt.s32.totalorder %v881_v48, %v834_v20  ;;  %s672_s30 = sshll.u32 %s1121_s13, 1 }
  0x11   : > { %713 = vmatprep.mubr.msk.bf16.mxu0 %vm255_vm1, %v748_v4  ;;  %v752_v7 = vld [vmem:[%s165_s24 + $0x20] sm:$0xff]   ;;  %v753_v8 = vld [vmem:[%s165_s24 + $0x28] sm:$0xff]   ;;  %v754_v9 = vld [vmem:[%s165_s24 + $0x30] sm:$0xff]   ;;  %s170_s6 = scalar_lea.vmem %s1111_s3, %s672_s30 }
  0x12   : > { %714 = vmatmul.mubr.msk.bf16.vlgmr.msra.gmra.mrb[0].mxu0 %vm255_vm1, %v749_v5  ;;  %721 = vmatprep.mubr.msk.bf16.mxu1 %vm255_vm1, %v752_v7  ;;  %v751_v10 = vld [vmem:[%s165_s24 + $0x18] sm:$0xff]   ;;  %v914_v7 = vadd.s32 64, %v825_v14 }
  0x13   : > { %717 = vmatprep.mubr.msk.bf16.mxu0 %vm255_vm1, %v750_v6  ;;  %722 = vmatmul.mubr.msk.bf16.vlgmr.msra.gmra.mrb[0].mxu1 %vm255_vm1, %v753_v8  ;;  %v755_v11 = vld [vmem:[%s165_s24 + $0x38] sm:$0xff]  }
  0x14   : > { %725 = vmatprep.mubr.msk.bf16.mxu1 %vm255_vm1, %v754_v9 }
  0x1a   : > { %718 = vmatmul.mubr.msk.bf16.gmra.mrb[4].mxu0 %vm255_vm1, %v751_v10 }
  0x1b   : > { %726 = vmatmul.mubr.msk.bf16.gmra.mrb[4].mxu1 %vm255_vm1, %v755_v11  ;;  %vm458_vm1 = vcmp.lt.s32.totalorder %v892_v54, %v834_v20 }
  0xe5   : > { %v715_v15 = vpop.f32.mrb[0].mxu0 }
  0xe6   : > { %v327_v16 = vadd.f32 %v715_v15, %v821_v13  ;;  %v318_v17 = vpop.f32.mrb[1].mxu0  ;;  %v831_v19 = vpop.f32.mrb[0].mxu1  ;;  %v929_v15 = vadd.s32 72, %v825_v14 }
  0xe7   : > { %v319_v21 = vadd.f32 %v821_v13, %v318_v17  ;;  %v716_v22 = vpop.f32.mrb[2].mxu0  ;;  %v350_v23 = vpop.f32.mrb[1].mxu1  ;;  %v359_v10 = vadd.f32 %v831_v19, %v821_v13 }
  0xe8   : > { %v330_v25 = vadd.f32 %v716_v22, %v821_v13  ;;  %v321_v27 = vpop.f32.mrb[3].mxu0  ;;  %v844_v28 = vpop.f32.mrb[2].mxu1  ;;  %v399_v29 = vmul.f32 0.01, %v327_v16  ;;  %vm383_vm3 = vcmp.ge.f32.partialorder %v327_v16, 0.0  ;;  %v351_v63 = vadd.f32 %v821_v13, %v350_v23 }
  0xe9   : > { %vm381_vm2 = vcmp.ge.f32.partialorder %v319_v21, 0.0  ;;  %v397_v30 = vmul.f32 0.01, %v319_v21  ;;  %v322_v31 = vadd.f32 %v821_v13, %v321_v27  ;;  %v353_v32 = vpop.f32.mrb[3].mxu1  ;;  %v940_v23 = vadd.s32 80, %v825_v14 }
  0xea   : > { %v400_v34 = vmul.f32 0.01, %v330_v25  ;;  %vm384_vm7 = vcmp.ge.f32.partialorder %v330_v25, 0.0  ;;  %v856_v37 = vsel %vm383_vm3, %v327_v16, %v399_v29  ;;  %v354_v5 = vadd.f32 %v821_v13, %v353_v32 }
  0xeb   : > { %v851_v33 = vsel %vm381_vm2, %v319_v21, %v397_v30  ;;  %vm382_vm6 = vcmp.ge.f32.partialorder %v322_v31, 0.0  ;;  %v398_v35 = vmul.f32 0.01, %v322_v31  ;;  %v501_v52 = vsel %vm453_vm8, %v856_v37, 0.0 }
  0xec   : > { %v499_v40 = vsel %vm451_vm4, %v851_v33, 0.0  ;;  %v878_v46 = vsel %vm384_vm7, %v330_v25, %v400_v34  ;;  %v405_v11 = vmul.f32 0.01, %v351_v63  ;;  %vm389_vm2 = vcmp.ge.f32.partialorder %v351_v63, 0.0 }
  0xed   : > { %v862_v38 = vsel %vm382_vm6, %v322_v31, %v398_v35  ;;  %v719_v39 = vpop.f32.mrb[4].mxu0  ;;  %v502_v61 = vsel %vm454_vm9, %v878_v46, 0.0  ;;  %v362_v21 = vadd.f32 %v844_v28, %v821_v13  ;;  %v406_v19 = vmul.f32 0.01, %v354_v5 }
  0xee   : > { %v500_v41 = vsel %vm452_vm5, %v862_v38, 0.0  ;;  %v343_v42 = vadd.f32 %v719_v39, %v821_v13  ;;  %v334_v43 = vpop.f32.mrb[5].mxu0  ;;  %v876_v45 = vpop.f32.mrb[4].mxu1  ;;  %vm459_vm3 = vcmp.lt.s32.totalorder %v914_v7, %v834_v20  ;;  %vm390_vm6 = vcmp.ge.f32.partialorder %v354_v5, 0.0 }
  0xef   : > { %v515_v47 = vadd.f32 %v500_v41, %v499_v40  ;;  %v335_v49 = vadd.f32 %v821_v13, %v334_v43  ;;  %v720_v50 = vpop.f32.mrb[6].mxu0  ;;  %v366_v51 = vpop.f32.mrb[5].mxu1  ;;  %v407_v27 = vmul.f32 0.01, %v359_v10  ;;  %v944_v29 = vsel %vm389_vm2, %v351_v63, %v405_v11 }
  0xf0   : > { %v346_v53 = vadd.f32 %v720_v50, %v821_v13  ;;  %v337_v55 = vpop.f32.mrb[7].mxu0  ;;  %v894_v56 = vpop.f32.mrb[6].mxu1  ;;  %v403_v62 = vmul.f32 0.01, %v343_v42  ;;  %vm387_vm13 = vcmp.ge.f32.partialorder %v343_v42, 0.0  ;;  %v367_v30 = vadd.f32 %v821_v13, %v366_v51 }
  0xf1   : > { %v516_v57 = vadd.f32 %v515_v47, %v501_v52  ;;  %vm385_vm11 = vcmp.ge.f32.partialorder %v335_v49, 0.0  ;;  %v401_v58 = vmul.f32 0.01, %v335_v49  ;;  %v338_v59 = vadd.f32 %v821_v13, %v337_v55  ;;  %v369_v60 = vpop.f32.mrb[7].mxu1 }
  0xf2   : > { %v404_v3 = vmul.f32 0.01, %v346_v53  ;;  %vm388_vm0 = vcmp.ge.f32.partialorder %v346_v53, 0.0  ;;  %v916_v8 = vsel %vm387_vm13, %v343_v42, %v403_v62  ;;  %vm391_vm7 = vcmp.ge.f32.partialorder %v359_v10, 0.0 }
  0xf3   : > { %v904_v0 = vsel %vm385_vm11, %v335_v49, %v401_v58  ;;  %v517_v1 = vadd.f32 %v516_v57, %v502_v61  ;;  %vm386_vm14 = vcmp.ge.f32.partialorder %v338_v59, 0.0  ;;  %v402_v4 = vmul.f32 0.01, %v338_v59 }
  0xf4   : > { %v503_v2 = vsel %vm455_vm10, %v904_v0, 0.0  ;;  %v931_v16 = vsel %vm388_vm0, %v346_v53, %v404_v3  ;;  %v505_v22 = vsel %vm457_vm15, %v916_v8, 0.0  ;;  %v952_v31 = vadd.s32 88, %v825_v14 }
  0xf5   : > { %v518_v6 = vadd.f32 %v517_v1, %v503_v2  ;;  %v918_v9 = vsel %vm386_vm14, %v338_v59, %v402_v4  ;;  %v506_v28 = vsel %vm458_vm1, %v931_v16, 0.0  ;;  %vm460_vm11 = vcmp.lt.s32.totalorder %v929_v15, %v834_v20 }
  0xf6   : > { %v504_v12 = vsel %vm456_vm12, %v918_v9, 0.0  ;;  %v408_v34 = vmul.f32 0.01, %v362_v21  ;;  %v956_v35 = vsel %vm390_vm6, %v354_v5, %v406_v19  ;;  %v370_v39 = vadd.f32 %v821_v13, %v369_v60 }
  0xf7   : > { %v519_v17 = vadd.f32 %v518_v6, %v504_v12  ;;  %vm1112_vm13 = vcmp.lt.s32.totalorder %v940_v23, %v834_v20  ;;  %v507_v40 = vsel %vm459_vm3, %v944_v29, 0.0  ;;  %vm392_vm14 = vcmp.ge.f32.partialorder %v362_v21, 0.0 }
  0xf8   : > { %v966_v41 = vadd.s32 96, %v825_v14  ;;  %v968_v42 = vsel %vm391_vm7, %v359_v10, %v407_v27  ;;  %v375_v47 = vadd.f32 %v876_v45, %v821_v13  ;;  %v409_v49 = vmul.f32 0.01, %v367_v30 }
  0xf9   : > { %v520_v25 = vadd.f32 %v519_v17, %v505_v22  ;;  %vm1113_vm0 = vcmp.lt.s32.totalorder %v952_v31, %v834_v20  ;;  %v508_v50 = vsel %vm460_vm11, %v956_v35, 0.0  ;;  %vm393_vm2 = vcmp.ge.f32.partialorder %v367_v30, 0.0 }
  0xfa   : > { %v979_v51 = vadd.s32 104, %v825_v14  ;;  %v981_v52 = vsel %vm392_vm14, %v362_v21, %v408_v34  ;;  %v378_v55 = vadd.f32 %v894_v56, %v821_v13  ;;  %v410_v45 = vmul.f32 0.01, %v370_v39 }
  0xfb   : > { %v521_v32 = vadd.f32 %v520_v25, %v506_v28  ;;  %v509_v57 = vsel %vm1112_vm13, %v968_v42, 0.0  ;;  %v990_v58 = vadd.s32 112, %v825_v14  ;;  %vm394_vm6 = vcmp.ge.f32.partialorder %v370_v39, 0.0 }
  0xfc   : > { %v411_v60 = vmul.f32 0.01, %v375_v47  ;;  %v992_v61 = vsel %vm393_vm2, %v367_v30, %v409_v49  ;;  %vm463_vm7 = vcmp.lt.s32.totalorder %v966_v41, %v834_v20  ;;  %v510_v13 = vsel %vm1113_vm0, %v981_v52, 0.0 }
  0xfd   : > { %v522_v43 = vadd.f32 %v521_v32, %v507_v40  ;;  %vm395_vm14 = vcmp.ge.f32.partialorder %v375_v47, 0.0  ;;  %v1001_v56 = vadd.s32 120, %v825_v14  ;;  %v412_v63 = vmul.f32 0.01, %v378_v55 }
  0xfe   : > { %v1003_v1 = vsel %vm394_vm6, %v370_v39, %v410_v45  ;;  %vm464_vm2 = vcmp.lt.s32.totalorder %v979_v51, %v834_v20  ;;  %v511_v2 = vsel %vm463_vm7, %v992_v61, 0.0  ;;  %vm396_vm13 = vcmp.ge.f32.partialorder %v378_v55, 0.0 }
  0xff   : > { %v523_v53 = vadd.f32 %v522_v43, %v508_v50  ;;  %v1011_v3 = vsel %vm395_vm14, %v375_v47, %v411_v60  ;;  %vm465_vm0 = vcmp.lt.s32.totalorder %v990_v58, %v834_v20  ;;  %v512_v5 = vsel %vm464_vm2, %v1003_v1, 0.0 }
 0x100   : > { %v1020_v6 = vsel %vm396_vm13, %v378_v55, %v412_v63  ;;  %vm466_vm6 = vcmp.lt.s32.totalorder %v1001_v56, %v834_v20  ;;  %v513_v11 = vsel %vm465_vm0, %v1011_v3, 0.0  ;;  %v537_v17 = vstv %s536_s29 }
 0x101   : > { %v524_v59 = vadd.f32 %v523_v53, %v509_v57  ;;  %v514_v21 = vsel %vm466_vm6, %v1020_v6, 0.0  ;;  %756 = vrcp.f32 %v537_v17 }
 0x103   : > { %v525_v62 = vadd.f32 %v524_v59, %v510_v13 }
 0x105   : > { %v526_v4 = vadd.f32 %v525_v62, %v511_v2 }
 0x107   : > { %v527_v10 = vadd.f32 %v526_v4, %v512_v5 }
 0x109   : > { %v528_v12 = vadd.f32 %v527_v10, %v513_v11 }
 0x10b   : > { %v529_v19 = vadd.f32 %v528_v12, %v514_v21  ;;  %v757_v32 = vpop.eup %756 }
 0x10d   : > { %v530_v22 = vrot.slane %v529_v19, 4 }
 0x10f   : > { %v531_v25 = vadd.f32 %v530_v22, %v529_v19 }
 0x111   : > { %v532_v27 = vrot.slane %v531_v25, 2 }
 0x113   : > { %v533_v30 = vadd.f32 %v532_v27, %v531_v25 }
 0x115   : > { %v534_v28 = vrot.slane %v533_v30, 1 }
 0x117   : > { %v1032_v34 = vadd.f32 %v534_v28, %v533_v30 }
 0x119   : > { %v539_v39 = vmul.f32 %v757_v32, %v1032_v34 }
 0x11b   : > { %v540_v40 = vsub.f32 %v851_v33, %v539_v39  ;;  %v541_v43 = vsub.f32 %v862_v38, %v539_v39  ;;  %v542_v47 = vsub.f32 %v856_v37, %v539_v39  ;;  %v543_v49 = vsub.f32 %v878_v46, %v539_v39 }
 0x11c   : > { %v544_v50 = vsub.f32 %v904_v0, %v539_v39  ;;  %v545_v53 = vsub.f32 %v918_v9, %v539_v39  ;;  %v546_v55 = vsub.f32 %v916_v8, %v539_v39  ;;  %v547_v45 = vsub.f32 %v931_v16, %v539_v39 }
 0x11d   : > { %v548_v57 = vsub.f32 %v944_v29, %v539_v39  ;;  %v549_v59 = vsub.f32 %v956_v35, %v539_v39  ;;  %v550_v33 = vsub.f32 %v968_v42, %v539_v39  ;;  %v551_v38 = vsub.f32 %v981_v52, %v539_v39 }
 0x11e   : > { %v552_v37 = vsub.f32 %v992_v61, %v539_v39  ;;  %v553_v46 = vsub.f32 %v1003_v1, %v539_v39  ;;  %v554_v0 = vsub.f32 %v1011_v3, %v539_v39  ;;  %v555_v9 = vsub.f32 %v1020_v6, %v539_v39 }
 0x11f   : > { %v556_v8 = vsel %vm451_vm4, %v540_v40, 0.0  ;;  %v557_v16 = vsel %vm452_vm5, %v541_v43, 0.0  ;;  %v558_v42 = vsel %vm453_vm8, %v542_v47, 0.0  ;;  %v559_v52 = vsel %vm454_vm9, %v543_v49, 0.0 }
 0x120   : > { %v572_v29 = vmul.f32 %v556_v8, %v556_v8  ;;  %v573_v35 = vmul.f32 %v557_v16, %v557_v16  ;;  %v574_v60 = vmul.f32 %v558_v42, %v558_v42  ;;  %v560_v14 = vsel %vm455_vm10, %v544_v50, 0.0 }
 0x121   : > { %v575_v13 = vmul.f32 %v559_v52, %v559_v52  ;;  %v561_v18 = vsel %vm456_vm12, %v545_v53, 0.0  ;;  %v576_v63 = vmul.f32 %v560_v14, %v560_v14  ;;  %v562_v24 = vsel %vm457_vm15, %v546_v55, 0.0 }
 0x122   : > { %v588_v61 = vadd.f32 %v573_v35, %v572_v29  ;;  %v577_v26 = vmul.f32 %v561_v18, %v561_v18  ;;  %v563_v3 = vsel %vm458_vm1, %v547_v45, 0.0  ;;  %v578_v36 = vmul.f32 %v562_v24, %v562_v24 }
 0x123   : > { %v564_v5 = vsel %vm459_vm3, %v548_v57, 0.0  ;;  %v579_v44 = vmul.f32 %v563_v3, %v563_v3  ;;  %v565_v10 = vsel %vm460_vm11, %v549_v59, 0.0  ;;  %vm1114_vm4 = vcmp.lt.s32.totalorder %v940_v23, %v834_v20 }
 0x124   : > { %v589_v62 = vadd.f32 %v588_v61, %v574_v60  ;;  %v580_v48 = vmul.f32 %v564_v5, %v564_v5  ;;  %v566_v12 = vsel %vm1114_vm4, %v550_v33, 0.0  ;;  %v581_v54 = vmul.f32 %v565_v10, %v565_v10 }
 0x125   : > { %vm1115_vm5 = vcmp.lt.s32.totalorder %v952_v31, %v834_v20  ;;  %v582_v7 = vmul.f32 %v566_v12, %v566_v12  ;;  %v568_v15 = vsel %vm463_vm7, %v552_v37, 0.0  ;;  %v569_v23 = vsel %vm464_vm2, %v553_v46, 0.0 }
 0x126   : > { %v590_v1 = vadd.f32 %v589_v62, %v575_v13  ;;  %v567_v21 = vsel %vm1115_vm5, %v551_v38, 0.0  ;;  %v584_v27 = vmul.f32 %v568_v15, %v568_v15  ;;  %v570_v31 = vsel %vm465_vm0, %v554_v0, 0.0 }
 0x127   : > { %v583_v22 = vmul.f32 %v567_v21, %v567_v21  ;;  %v585_v28 = vmul.f32 %v569_v23, %v569_v23  ;;  %v571_v41 = vsel %vm466_vm6, %v555_v9, 0.0  ;;  %v586_v39 = vmul.f32 %v570_v31, %v570_v31 }
 0x128   : > { %v591_v2 = vadd.f32 %v590_v1, %v576_v63  ;;  %v587_v43 = vmul.f32 %v571_v41, %v571_v41  ;;  %vm609_vm8 = vcmask 1040384  }
 0x12a   : > { %v592_v4 = vadd.f32 %v591_v2, %v577_v26 }
 0x12c   : > { %v593_v6 = vadd.f32 %v592_v4, %v578_v36 }
 0x12e   : > { %v594_v11 = vadd.f32 %v593_v6, %v579_v44 }
 0x130   : > { %v595_v17 = vadd.f32 %v594_v11, %v580_v48 }
 0x132   : > { %v596_v19 = vadd.f32 %v595_v17, %v581_v54 }
 0x134   : > { %v597_v25 = vadd.f32 %v596_v19, %v582_v7 }
 0x136   : > { %v598_v30 = vadd.f32 %v597_v25, %v583_v22 }
 0x138   : > { %v599_v32 = vadd.f32 %v598_v30, %v584_v27 }
 0x13a   : > { %v600_v40 = vadd.f32 %v599_v32, %v585_v28 }
 0x13c   : > { %v601_v47 = vadd.f32 %v600_v40, %v586_v39 }
 0x13e   : > { %v602_v49 = vadd.f32 %v601_v47, %v587_v43 }
 0x140   : > { %v603_v51 = vrot.slane %v602_v49, 4 }
 0x142   : > { %v604_v50 = vadd.f32 %v603_v51, %v602_v49 }
 0x144   : > { %v605_v53 = vrot.slane %v604_v50, 2 }
 0x146   : > { %v606_v55 = vadd.f32 %v605_v53, %v604_v50 }
 0x148   : > { %v607_v58 = vrot.slane %v606_v55, 1 }
 0x14a   : > { %v608_v20 = vadd.f32 %v607_v58, %v606_v55 }
 0x14c   : > { %v610_v56 = vsel %vm609_vm8, %v1032_v34, %v608_v20 }
 0x14d   : > { %611 = vst [vmem:[%s170_s6] sm:$0x3] %v610_v56 }
 0x14e PF: > { %s13_s12 = sadd.s32 1, %s764_s12  }
 0x14f   : > { %p10_p6 = scmp.ge.s32.totalorder %s13_s12, 6  }
 0x151   :  { %12 = sbr.rel (!%p10_p6) target bundleno = 1 (0x1), region = 62 }

</bundles_post_ra>
